<compile_context>
chip_gen: v7x
topology: tpu7x:2x2x1
jax: 0.10.0
libtpu: 0.0.40
codegen_flags: <defaults>
</compile_context>

<pallas_src>
import functools
import math

import jax
import jax.numpy as jnp
from jax.experimental import pallas as pl
from jax.experimental.pallas import tpu as pltpu


def _ceil_div(a, b):
    return -(-a // b)


def _choose_packing(num_classes, r_cap=16):
    """Pick (R rows packed per lane-row, padded class count Cp) with R*Cp % 128 == 0.

    Minimize class padding first (class padding costs HBM bandwidth), then R
    (the one-hot reconstruction costs ~2 wide VPU ops per packed row).
    """
    best = None
    for r in range(1, r_cap + 1):
        step = 128 // math.gcd(r, 128)          # Cp must be a multiple of this
        cp = _ceil_div(num_classes, step) * step
        key = (cp, r)
        if best is None or key < best[0]:
            best = (key, r, cp)
    _, r, cp = best
    return r, cp


def _focal_loss_kernel(pred_ref, lab_ref, out_ref, *, gamma, alpha):
    pred = pred_ref[...]            # (tm, L) f32 logits, L = R*Cp (multiple of 128)
    labs = lab_ref[...]             # (tm, R) i32 lane positions of the target class
                                    #   (already offset by r*Cp; -1 = background/pad)
    tm, L = pred.shape
    R = labs.shape[1]
    lane = jax.lax.broadcasted_iota(jnp.int32, (tm, L), 1)

    # one_hot(target, C+1)[:, :-1] for the R packed rows: 1 wide compare + 1 OR per r.
    # A -1 / background position never matches any lane; no validity mask needed.
    t_mask = lane == labs[:, 0:1]
    for r in range(1, R):
        t_mask = t_mask | (lane == labs[:, r:r + 1])

    # Stable sigmoid focal BCE via xs = (1-2t)*x:
    #   pt  = sigmoid(xs)            (== (1-p)*t + p*(1-t))
    #   bce = relu(xs) + log1p(e)    (== binary_cross_entropy_with_logits, 'none')
    xs = jnp.where(t_mask, -pred, pred)
    e = jnp.exp(-jnp.abs(pred))                          # |xs| == |pred|
    inv = pl.reciprocal(1.0 + e, approx=True)            # EUP slot, no VPU refinement
    pt = jnp.where(xs >= 0, inv, e * inv)
    bce = jnp.maximum(xs, 0.0) + jnp.log1p(e)
    aw = jnp.where(t_mask, alpha, 1.0 - alpha)
    if gamma == 2.0:
        ptg = pt * pt                                    # fast path: one VPU mul
    else:
        ptg = jnp.power(pt, gamma)                       # general gamma (EUP)
    loss = bce * aw * ptg

    # Partial reduce (tm, L) -> (8, 128) with vreg-aligned slices / leading-axis sums
    # (pure VPU adds, unmasked lane-dense output). Final reduction in the wrapper.
    red = loss[:, 0:128]
    for g in range(1, L // 128):
        red = red + loss[:, g * 128:(g + 1) * 128]
    out_ref[0] = jnp.sum(red.reshape(tm // 8, 8, 128), axis=0)


def focal_loss(pred, target, *, gamma=2.0, alpha=0.25, loss_weight=1.0):
    """pred: (N, C) float logits; target: (N,) int labels in [0, C] (C == background)."""
    N, C = pred.shape
    pred = pred.astype(jnp.float32)
    target = target.astype(jnp.int32)

    R, Cp = _choose_packing(C)
    L = R * Cp                                           # packed lane width, % 128 == 0

    # VMEM budget per buffer set (Pallas double-buffers): pred block (4*L B/row)
    # plus the lane-padded (tm, 128) i32 target block (512 B/row).
    row_bytes = 4 * L + 512
    budget = 4 * 1024 * 1024
    tm_cap = max(8, (budget // row_bytes) // 8 * 8)

    Np_raw = _ceil_div(N, R)                             # packed rows needed
    G = max(1, _ceil_div(Np_raw, tm_cap))
    if G == 1 and Np_raw >= 16:
        G = 2                                            # let v7x use both TensorCores
    if G > 1 and G % 2 == 1:
        G += 1                                           # even split across 2 TCs
    tm = _ceil_div(_ceil_div(Np_raw, G), 8) * 8
    Np_pad = G * tm
    N_pad = Np_pad * R

    if N_pad != N or Cp != C:
        pred = jnp.pad(pred, ((0, N_pad - N), (0, Cp - C)))     # zeros
    if N_pad != N:
        target = jnp.pad(target, (0, N_pad - N), constant_values=-1)

    # Precompute clamped, group-offset label lane positions (tiny O(N) int op in the
    # wrapper; removes every narrow per-column op from the kernel).
    labels = target.reshape(Np_pad, R)
    r_off = (jnp.arange(R, dtype=jnp.int32) * Cp)[None, :]
    lab_pos = jnp.where((labels >= 0) & (labels < C), labels + r_off, -1).astype(jnp.int32)

    pred_packed = pred.reshape(Np_pad, L)   # packed row p = original rows p*R..p*R+R-1

    kernel = functools.partial(_focal_loss_kernel, gamma=float(gamma), alpha=float(alpha))

    partials = pl.pallas_call(
        kernel,
        out_shape=jax.ShapeDtypeStruct((G, 8, 128), jnp.float32),
        grid_spec=pltpu.PrefetchScalarGridSpec(
            num_scalar_prefetch=0,
            grid=(G,),
            in_specs=[
                pl.BlockSpec((tm, L), lambda i: (i, 0)),
                pl.BlockSpec((tm, R), lambda i: (i, 0)),
            ],
            out_specs=pl.BlockSpec((1, 8, 128), lambda i: (i, 0, 0)),
        ),
        compiler_params=pltpu.CompilerParams(
            dimension_semantics=("parallel",),
            vmem_limit_bytes=32 * 1024 * 1024),
    )(pred_packed, lab_pos)

    total = jnp.sum(partials)
    # Every padded element (padded rows and padded class lanes) has pred == 0 and
    # t == 0, contributing exactly ln(2)*(1-alpha)*0.5**gamma; remove analytically.
    padded_elems = Np_pad * L - N * C
    if padded_elems:
        total = total - padded_elems * (math.log(2.0) * (1.0 - alpha) * (0.5 ** gamma))

    # reduction='mean', weight=None, avg_factor=None: mean over the original N*C.
    return total * (loss_weight / float(N * C))


def _focal_loss_ref(pred, target, gamma=2.0, alpha=0.25, loss_weight=1.0):
    N, C = pred.shape
    t = jax.nn.one_hot(target, C + 1, dtype=pred.dtype)[:, :-1]
    p = jax.nn.sigmoid(pred)
    pt = (1 - p) * t + p * (1 - t)
    fw = (alpha * t + (1 - alpha) * (1 - t)) * pt ** gamma
    bce = jnp.maximum(pred, 0.0) - pred * t + jnp.log1p(jnp.exp(-jnp.abs(pred)))
    return loss_weight * jnp.mean(bce * fw)


if __name__ == "__main__":
    key = jax.random.PRNGKey(0)
    k_pred, k_tgt = jax.random.split(key)

    N, C = 64, 16  # 64 anchors, 16 foreground classes
    pred = jax.random.normal(k_pred, (N, C), dtype=jnp.float32) * 2.0
    # labels in [0, C]; label == C means background (all-zero one-hot row)
    target = jax.random.randint(k_tgt, (N,), 0, C + 1, dtype=jnp.int32)

    loss = focal_loss(pred, target, gamma=2.0, alpha=0.25, loss_weight=1.0)
    jax.block_until_ready(loss)

    ref = _focal_loss_ref(pred, target)
    # Tolerance loosened vs 1e-5 because of the approx (EUP) reciprocal in sigmoid.
    assert jnp.allclose(loss, ref, atol=1e-3, rtol=1e-3), (loss, ref)

    print("KERNEL_OK")
</pallas_src>

<mosaic_0001>
module attributes {stable_mosaic.version = 11 : i64} {
  func.func @_focal_loss_kernel(%arg0: i32, %arg1: memref<8x128xf32, #tpu.memory_space<vmem>>, %arg2: memref<8x8xi32, #tpu.memory_space<vmem>>, %arg3: memref<1x8x128xf32, #tpu.memory_space<vmem>>) attributes {dimension_semantics = [#tpu.dimension_semantics<parallel>], iteration_bounds = array<i64: 1>, scalar_prefetch = 0 : i64, scratch_operands = 0 : i64, tpu.core_type = #tpu.core_type<tc>, window_params = [{transform_indices = @transform_0, window_bounds = array<i64: 8, 128>}, {transform_indices = @transform_1, window_bounds = array<i64: 8, 8>}, {transform_indices = @transform_2, window_bounds = array<i64: 1, 8, 128>}]} {
    %c0 = arith.constant 0 : index
    %c0_0 = arith.constant 0 : index
    %0 = vector.load %arg1[%c0, %c0_0] : memref<8x128xf32, #tpu.memory_space<vmem>>, vector<8x128xf32>
    %c0_1 = arith.constant 0 : index
    %c0_2 = arith.constant 0 : index
    %1 = vector.load %arg2[%c0_1, %c0_2] : memref<8x8xi32, #tpu.memory_space<vmem>>, vector<8x8xi32>
    %2 = tpu.iota {dimensions = array<i32: 1>} : vector<8x128xi32>
    %3 = vector.extract_strided_slice %1 {offsets = [0, 0], sizes = [8, 1], strides = [1, 1]} : vector<8x8xi32> to vector<8x1xi32>
    %4 = vector.broadcast %3 : vector<8x1xi32> to vector<8x128xi32>
    %5 = arith.cmpi eq, %2, %4 : vector<8x128xi32>
    %6 = vector.extract_strided_slice %1 {offsets = [0, 1], sizes = [8, 1], strides = [1, 1]} : vector<8x8xi32> to vector<8x1xi32>
    %7 = vector.broadcast %6 : vector<8x1xi32> to vector<8x128xi32>
    %8 = arith.cmpi eq, %2, %7 : vector<8x128xi32>
    %9 = arith.ori %5, %8 : vector<8x128xi1>
    %10 = vector.extract_strided_slice %1 {offsets = [0, 2], sizes = [8, 1], strides = [1, 1]} : vector<8x8xi32> to vector<8x1xi32>
    %11 = vector.broadcast %10 : vector<8x1xi32> to vector<8x128xi32>
    %12 = arith.cmpi eq, %2, %11 : vector<8x128xi32>
    %13 = arith.ori %9, %12 : vector<8x128xi1>
    %14 = vector.extract_strided_slice %1 {offsets = [0, 3], sizes = [8, 1], strides = [1, 1]} : vector<8x8xi32> to vector<8x1xi32>
    %15 = vector.broadcast %14 : vector<8x1xi32> to vector<8x128xi32>
    %16 = arith.cmpi eq, %2, %15 : vector<8x128xi32>
    %17 = arith.ori %13, %16 : vector<8x128xi1>
    %18 = vector.extract_strided_slice %1 {offsets = [0, 4], sizes = [8, 1], strides = [1, 1]} : vector<8x8xi32> to vector<8x1xi32>
    %19 = vector.broadcast %18 : vector<8x1xi32> to vector<8x128xi32>
    %20 = arith.cmpi eq, %2, %19 : vector<8x128xi32>
    %21 = arith.ori %17, %20 : vector<8x128xi1>
    %22 = vector.extract_strided_slice %1 {offsets = [0, 5], sizes = [8, 1], strides = [1, 1]} : vector<8x8xi32> to vector<8x1xi32>
    %23 = vector.broadcast %22 : vector<8x1xi32> to vector<8x128xi32>
    %24 = arith.cmpi eq, %2, %23 : vector<8x128xi32>
    %25 = arith.ori %21, %24 : vector<8x128xi1>
    %26 = vector.extract_strided_slice %1 {offsets = [0, 6], sizes = [8, 1], strides = [1, 1]} : vector<8x8xi32> to vector<8x1xi32>
    %27 = vector.broadcast %26 : vector<8x1xi32> to vector<8x128xi32>
    %28 = arith.cmpi eq, %2, %27 : vector<8x128xi32>
    %29 = arith.ori %25, %28 : vector<8x128xi1>
    %30 = vector.extract_strided_slice %1 {offsets = [0, 7], sizes = [8, 1], strides = [1, 1]} : vector<8x8xi32> to vector<8x1xi32>
    %31 = vector.broadcast %30 : vector<8x1xi32> to vector<8x128xi32>
    %32 = arith.cmpi eq, %2, %31 : vector<8x128xi32>
    %33 = arith.ori %29, %32 : vector<8x128xi1>
    %cst = arith.constant 0.000000e+00 : f32
    %34 = vector.broadcast %cst : f32 to vector<8x128xf32>
    %35 = arith.subf %34, %0 : vector<8x128xf32>
    %36 = arith.select %33, %35, %0 : vector<8x128xi1>, vector<8x128xf32>
    %37 = math.absf %0 : vector<8x128xf32>
    %cst_3 = arith.constant 0.000000e+00 : f32
    %38 = vector.broadcast %cst_3 : f32 to vector<8x128xf32>
    %39 = arith.subf %38, %37 : vector<8x128xf32>
    %40 = math.exp %39 : vector<8x128xf32>
    %cst_4 = arith.constant 1.000000e+00 : f32
    %41 = vector.broadcast %cst_4 : f32 to vector<8x128xf32>
    %42 = arith.addf %41, %40 : vector<8x128xf32>
    %43 = tpu.reciprocal %42 {approx = true} : vector<8x128xf32> -> vector<8x128xf32>
    %cst_5 = arith.constant 0.000000e+00 : f32
    %44 = vector.broadcast %cst_5 : f32 to vector<8x128xf32>
    %45 = arith.cmpf oge, %36, %44 : vector<8x128xf32>
    %46 = arith.mulf %40, %43 : vector<8x128xf32>
    %47 = arith.select %45, %43, %46 : vector<8x128xi1>, vector<8x128xf32>
    %cst_6 = arith.constant 0.000000e+00 : f32
    %48 = vector.broadcast %cst_6 : f32 to vector<8x128xf32>
    %49 = arith.maximumf %36, %48 : vector<8x128xf32>
    %50 = math.log1p %40 : vector<8x128xf32>
    %51 = arith.addf %49, %50 : vector<8x128xf32>
    %cst_7 = arith.constant 2.500000e-01 : f32
    %cst_8 = arith.constant 7.500000e-01 : f32
    %52 = vector.broadcast %cst_7 : f32 to vector<8x128xf32>
    %53 = vector.broadcast %cst_8 : f32 to vector<8x128xf32>
    %54 = arith.select %33, %52, %53 : vector<8x128xi1>, vector<8x128xf32>
    %55 = arith.mulf %47, %47 : vector<8x128xf32>
    %56 = arith.mulf %51, %54 : vector<8x128xf32>
    %57 = arith.mulf %56, %55 : vector<8x128xf32>
    %58 = vector.shape_cast %57 : vector<8x128xf32> to vector<1x8x128xf32>
    %cst_9 = arith.constant dense<0.000000e+00> : vector<8x128xf32>
    %59 = vector.multi_reduction <add>, %58, %cst_9 [0] : vector<1x8x128xf32> to vector<8x128xf32>
    %c0_10 = arith.constant 0 : index
    %c0_11 = arith.constant 0 : index
    %c0_12 = arith.constant 0 : index
    %60 = vector.load %arg3[%c0_10, %c0_11, %c0_12] : memref<1x8x128xf32, #tpu.memory_space<vmem>>, vector<1x8x128xf32>
    %61 = vector.shape_cast %60 : vector<1x8x128xf32> to vector<8x128xf32>
    %62 = vector.shape_cast %59 : vector<8x128xf32> to vector<1x8x128xf32>
    tpu.vector_store %arg3[%c0_10, %c0_11, %c0_12], %62 {strides = array<i32>} : memref<1x8x128xf32, #tpu.memory_space<vmem>>, vector<1x8x128xf32>,
    return
  }
  func.func @transform_0(%arg0: i32) -> (i32, i32) {
    %c0_i32 = arith.constant 0 : i32
    %c0_i32_0 = arith.constant 0 : i32
    return %arg0, %c0_i32 : i32, i32
  }
  func.func @transform_1(%arg0: i32) -> (i32, i32) {
    %c0_i32 = arith.constant 0 : i32
    %c0_i32_0 = arith.constant 0 : i32
    return %arg0, %c0_i32 : i32, i32
  }
  func.func @transform_2(%arg0: i32) -> (i32, i32, i32) {
    %c0_i32 = arith.constant 0 : i32
    %c0_i32_0 = arith.constant 0 : i32
    %c0_i32_1 = arith.constant 0 : i32
    return %arg0, %c0_i32, %c0_i32_0 : i32, i32, i32
  }
}

</mosaic_0001>

<bundles_post_ra>
// kernel: tpu_custom_call.1
= control target key start
LH: loop header
LB: loop body
LE: loop exit
PB: predicated region body
PF: predicated region fallthrough
CT: control target
= control target key end

     0   :  { %7 = vsyncpa [#allocation3], 0  ;;  %s285_s0 = inlined_call_operand.hbm [shape: f32[8,128], index: 0, kind: input, shape index: {}]   ;;  %s286_s1 = inlined_call_operand.hbm [shape: s32[8,8], index: 1, kind: input, shape index: {}]   ;;  %s287_s2 = inlined_call_operand.hbm [shape: f32[1,8,128], index: 2, kind: output, shape index: {}]  }
   0x1   :  { %8 = vsyncpa [#allocation6], 0 }
   0x2   :  { %9 = vsyncpa [#allocation4], 0  ;;  %s222_s9 = smov [#allocation2]   ;;  %s223_s11 = smov [#allocation5]  }
   0x3   :  { %s16_s10 = sshll.u32 %s222_s9, 4  ;;  %s26_s12 = sshll.u32 %s223_s11, 4  ;;  %s17_s10 = int_to_ptr.vmem [resolvable:$true] %s16_s10  ;;  %s27_s12 = int_to_ptr.vmem [resolvable:$true] %s26_s12 }
   0x4   :  { %s150_s15 = scalar_lea.hbm %s285_s0, 128 }
   0x5   :  { %p151_p0 = scmp.ne.s32.totalorder %s285_s0, %s150_s15  ;;  %p154_p1 = scmp.lt.u32.totalorder %s150_s15, %s285_s0 }
   0x7   :  { %p156_p2 = pnand %p154_p1, %p151_p0 }
   0x9   :  { %159 = shalt.err (!%p156_p2)
}
   0xa   :  { %s160_s20 = scalar_lea.vmem %s17_s10, 128  ;;  %p165_p4 = scmp.lt.s32.totalorder %s17_s10, %s17_s10 }
   0xb   :  { %p161_p3 = scmp.ne.s32.totalorder %s17_s10, %s160_s20  ;;  %p166_p5 = scmp.lt.s32.totalorder %s160_s20, %s160_s20 }
   0xd   :  { %p167_p6 = por %p166_p5, %p165_p4 }
   0xf   :  { %p168_p7 = pnand %p167_p6, %p161_p3 }
  0x11   :  { %171 = shalt.err (!%p168_p7)
}
  0x12   :  { %19 = dma.hbm_to_vmem [thread:$0]  %s285_s0, 128, %s17_s10, [#allocation3]  }
  0x13   :  { %s172_s25 = scalar_lea.hbm %s286_s1, 128 }
  0x14   :  { %p173_p8 = scmp.ne.s32.totalorder %s286_s1, %s172_s25  ;;  %p176_p9 = scmp.lt.u32.totalorder %s172_s25, %s286_s1 }
  0x16   :  { %p178_p10 = pnand %p176_p9, %p173_p8 }
  0x18   :  { %181 = shalt.err (!%p178_p10)
}
  0x19   :  { %s182_s30 = scalar_lea.vmem %s27_s12, 128  ;;  %p187_p12 = scmp.lt.s32.totalorder %s27_s12, %s27_s12 }
  0x1a   :  { %p183_p11 = scmp.ne.s32.totalorder %s27_s12, %s182_s30  ;;  %p188_p13 = scmp.lt.s32.totalorder %s182_s30, %s182_s30 }
  0x1c   :  { %p189_p0 = por %p188_p13, %p187_p12 }
  0x1e   :  { %p190_p1 = pnand %p189_p0, %p183_p11 }
  0x20   :  { %193 = shalt.err (!%p190_p1)
}
  0x21   :  { %29 = dma.hbm_to_vmem [thread:$0]  %s286_s1, 128, %s27_s12, [#allocation6]  }
  0x22   :  { %216 = dma.done.wait [#allocation3], 128  }
  0x23   :  { %217 = vsyncadd [#allocation3], 4294967168 }
  0x24   :  { %218 = dma.done.wait [#allocation6], 128  }
  0x25   :  { %219 = vsyncadd [#allocation6], 4294967168  ;;  %v224_v0 = vmov 2   ;;  %v225_v1 = vmov 0   ;;  %v37_v2 = vld [vmem:[#allocation5] sm:$0xff]  ;;  %v226_v3 = vmov 3   ;;  %v38_v16 = vlaneseq }
  0x26   :  { %137 = vset.pattern.permute.xlu1 %v224_v0  ;;  %135 = vset.pattern.permute.xlu0 %v225_v1  ;;  %v227_v4 = vmov 1   ;;  %v228_v5 = vmov 4   ;;  %v229_v6 = vmov 5   ;;  %v230_v7 = vmov 6   ;;  %v36_v9 = vld [vmem:[#allocation2] sm:$0xff]  ;;  %s233_s1 = smov [#allocation7]  }
  0x27   :  { %50 = vperm.xlu1 %137, %v37_v2   ;;  %41 = vperm.xlu0 %135, %v37_v2   ;;  %v231_v8 = vmov 7   ;;  %v81_v10 = vand.u32 2147483647, %v36_v9  ;;  %v39_v18 = vand.u32 127, %v38_v16  ;;  %v79_v29 = vsub.f32 0.0, %v36_v9  ;;  %s113_s4 = sshll.u32 %s233_s1, 4  ;;  %s114_s4 = int_to_ptr.vmem [resolvable:$true] %s113_s4 }
  0x28   :  { %v232_v39 = vmov 0.75   ;;  %s194_s5 = scalar_lea.vmem %s114_s4, 128  ;;  %p199_p3 = scmp.lt.s32.totalorder %s114_s4, %s114_s4 }
  0x29   :  { %v82_v11 = vsub.f32 0.0, %v81_v10  ;;  %p195_p2 = scmp.ne.s32.totalorder %s114_s4, %s194_s5  ;;  %p200_p4 = scmp.lt.s32.totalorder %s194_s5, %s194_s5 }
  0x2b   :  { %138 = vset.pattern.permute.xlu1 %v226_v3  ;;  %136 = vset.pattern.permute.xlu0 %v227_v4  ;;  %v83_v12 = vmul.f32 1.442695, %v82_v11  ;;  %p201_p5 = por %p200_p4, %p199_p3 }
  0x2c   :  { %55 = vperm.xlu1 %138, %v37_v2   ;;  %45 = vperm.xlu0 %136, %v37_v2  }
  0x2d   :  { %144 = vpow2.f32 %v83_v12  ;;  %p202_p6 = pnand %p201_p5, %p195_p2 }
  0x30   :  { %139 = vset.pattern.permute.xlu1 %v228_v5  ;;  %140 = vset.pattern.permute.xlu0 %v229_v6 }
  0x31   :  { %60 = vperm.xlu1 %139, %v37_v2   ;;  %65 = vperm.xlu0 %140, %v37_v2  }
  0x35   :  { %141 = vset.pattern.permute.xlu1 %v230_v7  ;;  %143 = vset.pattern.permute.xlu0 %v231_v8 }
  0x36   :  { %70 = vperm.xlu1 %141, %v37_v2  }
  0x37   :  { %v145_v13 = vpop.eup %144 }
  0x38   :  { %v85_v17 = vadd.f32 1.0, %v145_v13  ;;  %v94_v22 = vmul.f32 -0.5, %v145_v13  ;;  %v97_v27 = vand.u32 2147483647, %v145_v13 }
  0x3a   :  { %142 = vset.pattern.permute.xlu1 %v231_v8  ;;  %146 = vlog2.f32 %v85_v17  ;;  %v95_v25 = vadd.f32 1.0, %v94_v22  ;;  %vm98_vm12 = vcmp.lt.f32.partialorder %v97_v27, 0.0004427343 }
  0x3b   :  { %75 = vperm.xlu1 %142, %v37_v2   ;;  %148 = vrcp.f32 %v85_v17 }
  0x3c   :  { %v96_v31 = vmul.f32 %v145_v13, %v95_v25 }
  0x44   :  { %v147_v26 = vpop.eup %146 }
  0x45   :  { %v149_v28 = vpop.eup %148  ;;  %v93_v30 = vmul.f32 0.6931472, %v147_v26 }
  0x46   :  { %v88_v33 = vmul.f32 %v149_v28, %v145_v13 }
  0x47   :  { %v99_v35 = vsel %vm98_vm12, %v96_v31, %v93_v30 }
  0xa6   :  { %v51_v14 = vpop.permute.xlu1 %50  ;;  %v42_v15 = vpop.permute.xlu0 %41 }
  0xa7   :  { %vm43_vm0 = vcmp.eq.s32.totalorder %v39_v18, %v42_v15  ;;  %vm52_vm3 = vcmp.eq.s32.totalorder %v39_v18, %v51_v14 }
  0xab   :  { %v56_v19 = vpop.permute.xlu1 %55  ;;  %v46_v20 = vpop.permute.xlu0 %45 }
  0xac   :  { %vm47_vm1 = vcmp.eq.s32.totalorder %v39_v18, %v46_v20  ;;  %vm57_vm6 = vcmp.eq.s32.totalorder %v39_v18, %v56_v19 }
  0xad   :  { %vm48_vm2 = vmor %vm43_vm0, %vm47_vm1 }
  0xae   :  { %vm53_vm4 = vmor %vm48_vm2, %vm52_vm3 }
  0xaf   :  { %vm58_vm7 = vmor %vm53_vm4, %vm57_vm6 }
  0xb0   :  { %v61_v21 = vpop.permute.xlu1 %60  ;;  %v66_v23 = vpop.permute.xlu0 %65 }
  0xb1   :  { %vm62_vm5 = vcmp.eq.s32.totalorder %v39_v18, %v61_v21  ;;  %vm67_vm9 = vcmp.eq.s32.totalorder %v39_v18, %v66_v23 }
  0xb2   :  { %vm63_vm8 = vmor %vm58_vm7, %vm62_vm5 }
  0xb3   :  { %vm68_vm11 = vmor %vm63_vm8, %vm67_vm9 }
  0xb5   :  { %v71_v24 = vpop.permute.xlu1 %70 }
  0xb6   :  { %vm72_vm10 = vcmp.eq.s32.totalorder %v39_v18, %v71_v24 }
  0xb7   :  { %vm73_vm13 = vmor %vm68_vm11, %vm72_vm10 }
  0xba   :  { %v76_v32 = vpop.permute.xlu1 %75 }
  0xbb   :  { %vm77_vm14 = vcmp.eq.s32.totalorder %v39_v18, %v76_v32 }
  0xbc   :  { %vm78_vm15 = vmor %vm73_vm13, %vm77_vm14 }
  0xbd   :  { %v80_v34 = vsel %vm78_vm15, %v79_v29, %v36_v9  ;;  %v101_v40 = vsel %vm78_vm15, 0.25, %v232_v39 }
  0xbe   :  { %vm87_vm0 = vcmp.ge.f32.partialorder %v80_v34, 0.0  ;;  %v90_v36 = vmax.f32 %v80_v34, 0.0 }
  0xbf   :  { %v89_v37 = vsel %vm87_vm0, %v149_v28, %v88_v33 }
  0xc0   :  { %v100_v38 = vadd.f32 %v99_v35, %v90_v36  ;;  %v102_v42 = vmul.f32 %v89_v37, %v89_v37 }
  0xc2   :  { %v103_v41 = vmul.f32 %v101_v40, %v100_v38 }
  0xc4   :  { %v104_v43 = vmul.f32 %v103_v41, %v102_v42 }
  0xc6   :  { %106 = vst [vmem:[#allocation7] sm:$0xff] %v104_v43 }
  0xc7   :  { %205 = shalt.err (!%p202_p6)
}
  0xc8   :  { %s206_s8 = scalar_lea.hbm %s287_s2, 128 }
  0xc9   :  { %p207_p7 = scmp.ne.s32.totalorder %s287_s2, %s206_s8  ;;  %p210_p8 = scmp.lt.u32.totalorder %s206_s8, %s287_s2 }
  0xcb   :  { %p212_p9 = pnand %p210_p8, %p207_p7 }
  0xcd   :  { %215 = shalt.err (!%p212_p9)
}
  0xce   :  { %116 = dma.vmem_to_hbm [thread:$0]  %s114_s4, 128, %s287_s2, [#allocation4]  }
  0xcf   :  { %220 = dma.done.wait [#allocation4], 128  }
  0xd0   :  { %221 = vsyncadd [#allocation4], 4294967168 }
  0xd1   :  { %120 = vsyncpa [#allocation3], 1 }
  0xd2   :  { %121 = vsyncpa [#allocation6], 1 }
  0xd3   :  { %122 = vsyncpa [#allocation4], 1 }

</bundles_post_ra>
